<compile_context>
chip_gen: v6e
topology: v6e:2x2x1
jax: 0.10.0
libtpu: 0.0.40
codegen_flags: <defaults>
</compile_context>

<pallas_src>
import jax
import jax.numpy as jnp
from jax.experimental import pallas as pl
from jax.experimental.pallas import tpu as pltpu


def _round_up(n, m):
    return ((n + m - 1) // m) * m


def _round_down(n, m):
    return (n // m) * m


def _pick_batch_tile(batch, bytes_per_row, target_block_bytes):
    """Rows per grid step: multiple of 8, multi-MiB blocks, >=2 grid steps when possible."""
    tb = max(8, _round_down(target_block_bytes // bytes_per_row, 8))
    if batch >= 16:
        # Keep at least two grid steps so v7x's two TensorCores both get work.
        tb = min(tb, _round_up((batch + 1) // 2, 8))
    tb = min(tb, _round_up(batch, 8))  # never allocate more rows than needed
    return tb


# ----------------------------------------------------------------------------
# Channels-last fast path (recommended: have the backbone emit NHWC directly).
# ----------------------------------------------------------------------------
def _head_channels_last_kernel(w_ref, b_ref, x_ref, out_ref):
    # w_ref:   (1, C)      f32  VMEM (constant block index -> fetched once)
    # b_ref:   (1, 1)      f32  SMEM scalar bias
    # x_ref:   (TB, 16, C) native dtype, channels-last batch tile
    # out_ref: (1, TB)     f32  lane-dense scores for this tile
    x = x_ref[...]                                   # keep native dtype (bf16 stays bf16)
    pooled = jnp.max(x, axis=1)                      # adaptive_max_pool2d(x, 1): (TB, C)
    feat = jnp.maximum(pooled, 0.0)                  # ReLU (exact in native dtype)
    feat32 = feat.astype(jnp.float32)                # weighted sum accumulates in f32
    scores = jnp.sum(feat32 * w_ref[...], axis=-1)   # VPU mul + XLU lane reduce: (TB,)
    out_ref[...] = (scores + b_ref[0, 0])[None, :]


def discriminator_head(x_cl, w, b, *, target_block_bytes=4 * 1024 * 1024):
    """Discriminator head on a channels-last feature map.

    x_cl: (B, 4, 4, C) or (B, 16, C) pre-pool feature map (any float dtype).
    w:    (1, C) parameter;  b: scalar parameter.
    Returns (B,) float32 scores, matching
      torch.sum(relu(adaptive_max_pool2d(x, 1).view(B, C)) * w, dim=1) + b.
    """
    if x_cl.ndim == 4:
        B, H, W, C = x_cl.shape
        assert H == 4 and W == 4, "discriminator head expects a 4x4 spatial map"
        x_cl = x_cl.reshape(B, H * W, C)             # free reshape (contiguous)
    B, S, C = x_cl.shape
    assert S == 16, "discriminator head expects a 4x4 spatial map"

    bytes_per_row = S * C * x_cl.dtype.itemsize
    tb = _pick_batch_tile(B, bytes_per_row, target_block_bytes)
    grid = pl.cdiv(B, tb)                            # last block may be partial

    w2 = jnp.asarray(w, jnp.float32).reshape(1, C)
    b2 = jnp.asarray(b, jnp.float32).reshape(1, 1)

    out = pl.pallas_call(
        _head_channels_last_kernel,
        out_shape=jax.ShapeDtypeStruct((grid, tb), jnp.float32),
        grid=(grid,),
        in_specs=[
            pl.BlockSpec((1, C), lambda i: (0, 0)),              # w (resident)
            pl.BlockSpec(memory_space=pltpu.MemorySpace.SMEM),   # b scalar
            pl.BlockSpec((tb, S, C), lambda i: (i, 0, 0)),       # feature tile
        ],
        out_specs=pl.BlockSpec((1, tb), lambda i: (i, 0)),
        compiler_params=pltpu.CompilerParams(
            dimension_semantics=("parallel",),
            vmem_limit_bytes=32 * 1024 * 1024,
        ),
    )(w2, b2, x_cl)

    # Partial-block rows >= B hold garbage scores; slice them off.
    return out.reshape(grid * tb)[:B]


# ----------------------------------------------------------------------------
# NCHW path (module's native layout) — no XLA transpose, no extra HBM pass.
# The NCHW map is reshaped (free, contiguous) to (B, C//8, 128): each 128-lane
# row holds 8 consecutive channels x 16 spatial values.  The 4x4 spatial max is
# computed in-kernel with 4 lane-roll/max steps; lane 16k+15 of row g then
# holds the spatial max of channel 8g+k, and a zero-masked weight vector picks
# exactly those lanes for the weighted reduction.
# ----------------------------------------------------------------------------
def _head_nchw_kernel(wmask_ref, b_ref, x_ref, out_ref):
    # wmask_ref: (G, 128) f32, weight of channel 8g+k at lane 16k+15 of row g, 0 elsewhere
    # b_ref:     (1, 1)   f32 SMEM scalar bias
    # x_ref:     (TB, G, 128) native dtype batch tile (G = C // 8)
    # out_ref:   (1, TB)  f32 lane-dense scores
    tb, g, _ = x_ref.shape
    x = x_ref[...].astype(jnp.float32)               # f32 for the roll/max chain
    v = x.reshape(tb * g, 128)                       # layout-preserving (g % 8 == 0)
    # log2(16) roll-max steps on the XLU: lane 16k+15 ends up holding
    # max over lanes 16k..16k+15, i.e. the spatial max of channel 8*row+k.
    for s in (1, 2, 4, 8):
        v = jnp.maximum(v, pltpu.roll(v, s, axis=1))
    feat = jnp.maximum(v, 0.0).reshape(tb, g, 128)   # ReLU after pooling (matches torch order)
    weighted = feat * wmask_ref[...]                 # non-max lanes zeroed by the mask
    scores = jnp.sum(jnp.sum(weighted, axis=2), axis=1)   # (TB,)
    out_ref[...] = (scores + b_ref[0, 0])[None, :]


def discriminator_head_nchw(x_nchw, w, b, *, target_block_bytes=1 * 1024 * 1024):
    """Discriminator head on the (B, C, 4, 4) NCHW feature map (PyTorch layout)."""
    B, C, H, W = x_nchw.shape
    assert H == 4 and W == 4, "discriminator head expects a 4x4 spatial map"
    if C % 64 != 0:
        # Rare shape: fall back to an explicit relayout + channels-last kernel.
        # TODO(synk): extend the in-kernel roll trick to C % 64 != 0 if needed.
        x_cl = jnp.transpose(x_nchw, (0, 2, 3, 1))
        return discriminator_head(x_cl, w, b)

    G = C // 8
    x3 = x_nchw.reshape(B, G, 128)                   # free reshape (row-major contiguous)

    # Budget in f32-equivalent bytes: the kernel upcasts the block for the rolls.
    bytes_per_row = G * 128 * 4
    tb = _pick_batch_tile(B, bytes_per_row, target_block_bytes)
    grid = pl.cdiv(B, tb)

    w_f32 = jnp.asarray(w, jnp.float32).reshape(C)
    wmask = (jnp.zeros((G, 8, 16), jnp.float32)
             .at[:, :, 15].set(w_f32.reshape(G, 8))
             .reshape(G, 128))
    b2 = jnp.asarray(b, jnp.float32).reshape(1, 1)

    out = pl.pallas_call(
        _head_nchw_kernel,
        out_shape=jax.ShapeDtypeStruct((grid, tb), jnp.float32),
        grid=(grid,),
        in_specs=[
            pl.BlockSpec((G, 128), lambda i: (0, 0)),            # masked weights (resident)
            pl.BlockSpec(memory_space=pltpu.MemorySpace.SMEM),   # b scalar
            pl.BlockSpec((tb, G, 128), lambda i: (i, 0, 0)),     # feature tile
        ],
        out_specs=pl.BlockSpec((1, tb), lambda i: (i, 0)),
        compiler_params=pltpu.CompilerParams(
            dimension_semantics=("parallel",),
            vmem_limit_bytes=32 * 1024 * 1024,
        ),
    )(wmask, b2, x3)

    return out.reshape(grid * tb)[:B]


# ----------------------------------------------------------------------------
# Pure-JAX references.
# ----------------------------------------------------------------------------
def _reference_nchw(x_nchw, w, b):
    B, C = x_nchw.shape[0], x_nchw.shape[1]
    pooled = jnp.max(x_nchw.astype(jnp.float32).reshape(B, C, -1), axis=-1)
    feat = jnp.maximum(pooled, 0.0)
    return jnp.sum(feat * jnp.asarray(w, jnp.float32).reshape(1, C), axis=1) + jnp.float32(b)


def _reference_channels_last(x_cl, w, b):
    B, C = x_cl.shape[0], x_cl.shape[-1]
    pooled = jnp.max(x_cl.astype(jnp.float32).reshape(B, -1, C), axis=1)
    feat = jnp.maximum(pooled, 0.0)
    return jnp.sum(feat * jnp.asarray(w, jnp.float32).reshape(1, C), axis=1) + jnp.float32(b)


if __name__ == "__main__":
    key = jax.random.PRNGKey(0)
    k1, k2, k3, kw = jax.random.split(key, 4)
    C = 256
    w = jax.random.normal(kw, (1, C), dtype=jnp.float32) * 0.02
    b = jnp.float32(0.1)

    # 1) channels-last fast path, f32, tiny batch (single partial block).
    x1 = jax.random.normal(k1, (2, 4, 4, C), dtype=jnp.float32)
    s1 = discriminator_head(x1, w, b)
    jax.block_until_ready(s1)
    assert s1.shape == (2,)
    assert jnp.allclose(s1, _reference_channels_last(x1, w, b), atol=1e-4, rtol=1e-4)

    # 2) channels-last, bf16, 2-step grid with a partial last block (B=19, tb=16).
    x2 = jax.random.normal(k2, (19, 4, 4, C), dtype=jnp.float32).astype(jnp.bfloat16)
    s2 = discriminator_head(x2, w, b)
    jax.block_until_ready(s2)
    assert s2.shape == (19,)
    assert jnp.allclose(s2, _reference_channels_last(x2, w, b), atol=1e-3, rtol=1e-3)

    # 3) NCHW path (module's native layout), f32, single partial block.
    x3 = jax.random.normal(k3, (5, C, 4, 4), dtype=jnp.float32)
    s3 = discriminator_head_nchw(x3, w, b)
    jax.block_until_ready(s3)
    assert s3.shape == (5,)
    assert jnp.allclose(s3, _reference_nchw(x3, w, b), atol=1e-4, rtol=1e-4)

    # 4) NCHW path, bf16, 2-step grid with a partial last block (B=20, tb=16).
    x4 = jax.random.normal(k1, (20, C, 4, 4), dtype=jnp.float32).astype(jnp.bfloat16)
    s4 = discriminator_head_nchw(x4, w, b)
    jax.block_until_ready(s4)
    assert s4.shape == (20,)
    assert jnp.allclose(s4, _reference_nchw(x4, w, b), atol=1e-3, rtol=1e-3)

    print("KERNEL_OK")
</pallas_src>

<mosaic_0001>
module attributes {stable_mosaic.version = 11 : i64} {
  func.func @_head_channels_last_kernel(%arg0: i32, %arg1: memref<1x256xf32, #tpu.memory_space<vmem>>, %arg2: memref<1x1xf32, #tpu.memory_space<smem>>, %arg3: memref<8x16x256xf32, #tpu.memory_space<vmem>>, %arg4: memref<1x8xf32, #tpu.memory_space<vmem>>) attributes {dimension_semantics = [#tpu.dimension_semantics<parallel>], iteration_bounds = array<i64: 1>, scalar_prefetch = 0 : i64, scratch_operands = 0 : i64, tpu.core_type = #tpu.core_type<tc>, window_params = [{pipeline_mode = #tpu.pipeline_mode<synchronous>, transform_indices = @transform_0, window_bounds = array<i64: 1, 256>}, {transform_indices = @transform_1, window_bounds = array<i64: 1, 1>}, {transform_indices = @transform_2, window_bounds = array<i64: 8, 16, 256>}, {transform_indices = @transform_3, window_bounds = array<i64: 1, 8>}]} {
    %c0 = arith.constant 0 : index
    %c0_0 = arith.constant 0 : index
    %c0_1 = arith.constant 0 : index
    %0 = vector.load %arg3[%c0, %c0_0, %c0_1] : memref<8x16x256xf32, #tpu.memory_space<vmem>>, vector<8x16x256xf32>
    %cst = arith.constant dense<0xFF800000> : vector<8x256xf32>
    %1 = vector.multi_reduction <maximumf>, %0, %cst [1] : vector<8x16x256xf32> to vector<8x256xf32>
    %cst_2 = arith.constant 0.000000e+00 : f32
    %2 = vector.broadcast %cst_2 : f32 to vector<8x256xf32>
    %3 = arith.maximumf %1, %2 : vector<8x256xf32>
    %c0_3 = arith.constant 0 : index
    %c0_4 = arith.constant 0 : index
    %4 = vector.load %arg1[%c0_3, %c0_4] : memref<1x256xf32, #tpu.memory_space<vmem>>, vector<1x256xf32>
    %5 = vector.broadcast %4 : vector<1x256xf32> to vector<8x256xf32>
    %6 = arith.mulf %3, %5 : vector<8x256xf32>
    %cst_5 = arith.constant dense<0.000000e+00> : vector<8xf32>
    %7 = vector.multi_reduction <add>, %6, %cst_5 [1] : vector<8x256xf32> to vector<8xf32>
    %c0_6 = arith.constant 0 : index
    %c0_7 = arith.constant 0 : index
    %8 = memref.load %arg2[%c0_6, %c0_7] : memref<1x1xf32, #tpu.memory_space<smem>>
    %9 = vector.broadcast %8 : f32 to vector<8xf32>
    %10 = arith.addf %7, %9 : vector<8xf32>
    %11 = vector.shape_cast %10 : vector<8xf32> to vector<1x8xf32>
    %c0_8 = arith.constant 0 : index
    %c0_9 = arith.constant 0 : index
    %12 = vector.load %arg4[%c0_8, %c0_9] : memref<1x8xf32, #tpu.memory_space<vmem>>, vector<1x8xf32>
    tpu.vector_store %arg4[%c0_8, %c0_9], %11 {strides = array<i32>} : memref<1x8xf32, #tpu.memory_space<vmem>>, vector<1x8xf32>,
    return
  }
  func.func @transform_0(%arg0: i32) -> (i32, i32) {
    %c0_i32 = arith.constant 0 : i32
    %c0_i32_0 = arith.constant 0 : i32
    %c0_i32_1 = arith.constant 0 : i32
    return %c0_i32, %c0_i32_0 : i32, i32
  }
  func.func @transform_1(%arg0: i32) -> (i32, i32) {
    %c0_i32 = arith.constant 0 : i32
    %c0_i32_0 = arith.constant 0 : i32
    %c0_i32_1 = arith.constant 0 : i32
    return %c0_i32, %c0_i32_0 : i32, i32
  }
  func.func @transform_2(%arg0: i32) -> (i32, i32, i32) {
    %c0_i32 = arith.constant 0 : i32
    %c0_i32_0 = arith.constant 0 : i32
    %c0_i32_1 = arith.constant 0 : i32
    return %arg0, %c0_i32, %c0_i32_0 : i32, i32, i32
  }
  func.func @transform_3(%arg0: i32) -> (i32, i32) {
    %c0_i32 = arith.constant 0 : i32
    %c0_i32_0 = arith.constant 0 : i32
    return %arg0, %c0_i32 : i32, i32
  }
}

</mosaic_0001>

<bundles_post_ra>
// kernel: tpu_custom_call.1
= control target key start
LH: loop header
LB: loop body
LE: loop exit
PB: predicated region body
PF: predicated region fallthrough
CT: control target
= control target key end

     0   :  { %9 = vsyncpa [#allocation4], 0  ;;  %s438_s0 = inlined_call_operand.vmem [shape: f32[1,256], index: 0, kind: input, shape index: {}]   ;;  %s439_s1 = inlined_call_operand.<no memory space> [shape: f32[1,1], index: 1, kind: input, shape index: {}]   ;;  %s440_s2 = inlined_call_operand.hbm [shape: f32[2,16,256], index: 2, kind: input, shape index: {}]   ;;  %s441_s3 = inlined_call_operand.hbm [shape: f32[1,8], index: 3, kind: output, shape index: {}]  }
   0x1   :  { %10 = vsyncpa [#allocation5], 0 }
   0x2   :  { %19 = vsyncadd [#allocation4], 3072  ;;  %s350_s12 = smov [#allocation3]  }
   0x3   :  { %s20_s13 = sshll.u32 %s350_s12, 4  ;;  %s21_s13 = int_to_ptr.vmem [resolvable:$true] %s20_s13 }
   0x4   :  { %s314_s14 = scalar_lea.vmem %s21_s13, 1024  ;;  %s318_s15 = scalar_lea.vmem %s21_s13, 4096 }
   0x5   :  { %p315_p0 = scmp.ne.s32.totalorder %s21_s13, %s314_s14  ;;  %p319_p1 = scmp.lt.s32.totalorder %s21_s13, %s21_s13 }
   0x6   :  { %p320_p2 = scmp.lt.s32.totalorder %s318_s15, %s314_s14 }
   0x8   :  { %p321_p3 = por %p320_p2, %p319_p1 }
   0xa   :  { %p322_p4 = pnand %p321_p3, %p315_p0 }
   0xc   :  { %325 = shalt.err (!%p322_p4)
}
   0xd   :  { %s351_s16 = smov 256   ;;  %s352_s17 = smov 16  }
   0xe   :  { %26 = dma.hbm_to_vmem [thread:$0]  %s440_s2, 1024, %s21_s13, [#allocation4], %s351_s16, %s351_s16, %s352_s17  }
   0xf   :  { %346 = dma.done.wait [#allocation4], 4096  }
  0x10   :  { %347 = vsyncadd [#allocation4], 4294963200  ;;  %v30_v0 = vld [vmem:[#allocation3] sm:$0xff]  ;;  %v31_v1 = vld [vmem:[#allocation3 + $0x8] sm:$0xff]  ;;  %v192_v23 = vlaneseq  ;;  %vm235_vm0 = vcmask 1041409   ;;  %vm238_vm1 = vcmask 1042434  }
  0x11   :  { %v32_v2 = vld [vmem:[#allocation3 + $0x10] sm:$0xff]  ;;  %v33_v3 = vld [vmem:[#allocation3 + $0x18] sm:$0xff]  ;;  %v34_v4 = vld [vmem:[#allocation3 + $0x20] sm:$0xff]  ;;  %vm241_vm2 = vcmask 1043459   ;;  %vm244_vm3 = vcmask 1044484   ;;  %vm247_vm4 = vcmask 1045509  }
  0x12   :  { %v35_v5 = vld [vmem:[#allocation3 + $0x28] sm:$0xff]  ;;  %v62_v6 = vmax.f32 %v30_v0, %v32_v2  ;;  %v36_v7 = vld [vmem:[#allocation3 + $0x30] sm:$0xff]  ;;  %v37_v8 = vld [vmem:[#allocation3 + $0x38] sm:$0xff]  ;;  %v69_v10 = vmax.f32 %v31_v1, %v33_v3  ;;  %v378_v48 = vshrl.u32 %v192_v23, 7  ;;  %vm250_vm5 = vcmask 1046534   ;;  %s353_s22 = smov [#allocation6]  }
  0x13   :  { %v38_v9 = vld [vmem:[#allocation3 + $0x40] sm:$0xff]  ;;  %v39_v11 = vld [vmem:[#allocation3 + $0x48] sm:$0xff]  ;;  %v40_v12 = vld [vmem:[#allocation3 + $0x50] sm:$0xff]  ;;  %v76_v15 = vmax.f32 %v34_v4, %v36_v7  ;;  %v83_v16 = vmax.f32 %v35_v5, %v37_v8  ;;  %vm253_vm6 = vcmask 1047559   ;;  %s293_s23 = sshll.u32 %s353_s22, 4  ;;  %vm285_vm7 = vcmask 57344   ;;  %s294_s23 = int_to_ptr.vmem [resolvable:$true] %s293_s23 }
  0x14   :  { %v41_v13 = vld [vmem:[#allocation3 + $0x58] sm:$0xff]  ;;  %v63_v14 = vrot.slane %v62_v6, 4  ;;  %v42_v17 = vld [vmem:[#allocation3 + $0x60] sm:$0xff]  ;;  %v43_v18 = vld [vmem:[#allocation3 + $0x68] sm:$0xff]  ;;  %v70_v20 = vrot.slane %v69_v10, 4  ;;  %v90_v21 = vmax.f32 %v38_v9, %v40_v12  ;;  %v194_v3 = vsub.s32 0, %v378_v48  ;;  %p331_p6 = scmp.lt.s32.totalorder %s294_s23, %s294_s23 }
  0x15   :  { %v44_v19 = vld [vmem:[#allocation3 + $0x70] sm:$0xff]  ;;  %v97_v22 = vmax.f32 %v39_v11, %v41_v13  ;;  %v45_v24 = vld [vmem:[#allocation3 + $0x78] sm:$0xff]  ;;  %v77_v26 = vrot.slane %v76_v15, 4  ;;  %v84_v27 = vrot.slane %v83_v16, 4  ;;  %v46_v53 = vld [vmem:[#allocation3 + $0x80] sm:$0xff]  ;;  %v198_v4 = vsub.s32 1, %v378_v48 }
  0x16   :  { %v64_v25 = vmax.f32 %v62_v6, %v63_v14  ;;  %v104_v28 = vmax.f32 %v42_v17, %v44_v19  ;;  %v71_v29 = vmax.f32 %v69_v10, %v70_v20  ;;  %v91_v30 = vrot.slane %v90_v21, 4  ;;  %v47_v54 = vld [vmem:[#allocation3 + $0x88] sm:$0xff]  ;;  %v48_v55 = vld [vmem:[#allocation3 + $0x90] sm:$0xff]  ;;  %v49_v59 = vld [vmem:[#allocation3 + $0x98] sm:$0xff]  ;;  %s326_s24 = scalar_lea.vmem %s294_s23, 16  ;;  %s330_s25 = scalar_lea.vmem %s294_s23, 32 }
  0x17   :  { %v98_v31 = vrot.slane %v97_v22, 4  ;;  %v111_v32 = vmax.f32 %v43_v18, %v45_v24  ;;  %v78_v34 = vmax.f32 %v76_v15, %v77_v26  ;;  %v85_v35 = vmax.f32 %v83_v16, %v84_v27  ;;  %v50_v60 = vld [vmem:[#allocation3 + $0xa0] sm:$0xff]  ;;  %v51_v61 = vld [vmem:[#allocation3 + $0xa8] sm:$0xff]  ;;  %v52_v63 = vld [vmem:[#allocation3 + $0xb0] sm:$0xff]  ;;  %p327_p5 = scmp.ne.s32.totalorder %s294_s23, %s326_s24  ;;  %p332_p7 = scmp.lt.s32.totalorder %s330_s25, %s326_s24 }
  0x18   :  { %v65_v33 = vrot.slane %v64_v25, 2  ;;  %v105_v36 = vrot.slane %v104_v28, 4  ;;  %v72_v37 = vrot.slane %v71_v29, 2  ;;  %v92_v38 = vmax.f32 %v90_v21, %v91_v30  ;;  %v53_v0 = vld [vmem:[#allocation3 + $0xb8] sm:$0xff]  ;;  %v54_v1 = vld [vmem:[#allocation3 + $0xc0] sm:$0xff]  ;;  %v55_v5 = vld [vmem:[#allocation3 + $0xc8] sm:$0xff] }
  0x19   :  { %v99_v39 = vmax.f32 %v97_v22, %v98_v31  ;;  %v112_v40 = vrot.slane %v111_v32, 4  ;;  %v79_v42 = vrot.slane %v78_v34, 2  ;;  %v86_v43 = vrot.slane %v85_v35, 2  ;;  %v56_v6 = vld [vmem:[#allocation3 + $0xd0] sm:$0xff]  ;;  %v57_v7 = vld [vmem:[#allocation3 + $0xd8] sm:$0xff]  ;;  %v58_v12 = vld [vmem:[#allocation3 + $0xe0] sm:$0xff]  ;;  %p333_p8 = por %p332_p7, %p331_p6 }
  0x1a   :  { %v66_v41 = vmax.f32 %v64_v25, %v65_v33  ;;  %v106_v44 = vmax.f32 %v104_v28, %v105_v36  ;;  %v93_v45 = vrot.slane %v92_v38, 2  ;;  %v380_v50 = vmax.f32 %v71_v29, %v72_v37  ;;  %v60_v13 = vld [vmem:[#allocation3 + $0xf0] sm:$0xff]  ;;  %v59_v18 = vld [vmem:[#allocation3 + $0xe8] sm:$0xff]  ;;  %v61_v19 = vld [vmem:[#allocation3 + $0xf8] sm:$0xff] }
  0x1b   :  { %v100_v46 = vrot.slane %v99_v39, 2  ;;  %v113_v47 = vmax.f32 %v111_v32, %v112_v40  ;;  %v382_v51 = vmax.f32 %v78_v34, %v79_v42  ;;  %v384_v56 = vmax.f32 %v85_v35, %v86_v43  ;;  %p334_p9 = pnand %p333_p8, %p327_p5 }
  0x1c   :  { %v67_v49 = vrot.slane %v66_v41, 1  ;;  %v107_v52 = vrot.slane %v106_v44, 2  ;;  %v386_v57 = vmax.f32 %v92_v38, %v93_v45  ;;  %v74_v9 = vrot.slane %v380_v50, 1 }
  0x1d   :  { %v388_v58 = vmax.f32 %v99_v39, %v100_v46  ;;  %v114_v62 = vrot.slane %v113_v47, 2  ;;  %v81_v10 = vrot.slane %v382_v51, 1  ;;  %v118_v11 = vmax.f32 %v46_v53, %v48_v55 }
  0x1e   :  { %v390_v2 = vmax.f32 %v106_v44, %v107_v52  ;;  %v394_v8 = vmax.f32 %v66_v41, %v67_v49  ;;  %v88_v14 = vrot.slane %v384_v56, 1  ;;  %v95_v15 = vrot.slane %v386_v57, 1 }
  0x1f   :  { %v102_v16 = vrot.slane %v388_v58, 1  ;;  %v125_v17 = vmax.f32 %v47_v54, %v49_v59  ;;  %v115_v20 = vmax.f32 %v113_v47, %v114_v62  ;;  %v119_v21 = vrot.slane %v118_v11, 4 }
  0x20   :  { %v132_v22 = vmax.f32 %v50_v60, %v52_v63  ;;  %v139_v24 = vmax.f32 %v51_v61, %v53_v0  ;;  %v109_v25 = vrot.slane %v390_v2, 1  ;;  %v146_v27 = vmax.f32 %v54_v1, %v56_v6 }
  0x21   :  { %v126_v26 = vrot.slane %v125_v17, 4  ;;  %v153_v28 = vmax.f32 %v55_v5, %v57_v7  ;;  %v120_v29 = vmax.f32 %v118_v11, %v119_v21  ;;  %v160_v32 = vmax.f32 %v58_v12, %v60_v13 }
  0x22   :  { %v133_v30 = vrot.slane %v132_v22, 4  ;;  %v140_v31 = vrot.slane %v139_v24, 4  ;;  %v147_v34 = vrot.slane %v146_v27, 4  ;;  %v167_v36 = vmax.f32 %v59_v18, %v61_v19 }
  0x23   :  { %v127_v33 = vmax.f32 %v125_v17, %v126_v26  ;;  %v154_v35 = vrot.slane %v153_v28, 4  ;;  %v121_v37 = vrot.slane %v120_v29, 2  ;;  %v161_v40 = vrot.slane %v160_v32, 4 }
  0x24   :  { %v134_v38 = vmax.f32 %v132_v22, %v133_v30  ;;  %v141_v39 = vmax.f32 %v139_v24, %v140_v31  ;;  %v148_v42 = vmax.f32 %v146_v27, %v147_v34  ;;  %v168_v44 = vrot.slane %v167_v36, 4 }
  0x25   :  { %v128_v41 = vrot.slane %v127_v33, 2  ;;  %v155_v43 = vmax.f32 %v153_v28, %v154_v35  ;;  %v122_v45 = vmax.f32 %v120_v29, %v121_v37  ;;  %v162_v49 = vmax.f32 %v160_v32, %v161_v40 }
  0x26   :  { %v135_v46 = vrot.slane %v134_v38, 2  ;;  %v142_v47 = vrot.slane %v141_v39, 2  ;;  %v149_v53 = vrot.slane %v148_v42, 2  ;;  %v169_v55 = vmax.f32 %v167_v36, %v168_v44 }
  0x27   :  { %v129_v52 = vmax.f32 %v127_v33, %v128_v41  ;;  %v156_v54 = vrot.slane %v155_v43, 2  ;;  %v116_v59 = vrot.slane %v115_v20, 1  ;;  %v163_v62 = vrot.slane %v162_v49, 2 }
  0x28   :  { %v136_v60 = vmax.f32 %v134_v38, %v135_v46  ;;  %v143_v61 = vmax.f32 %v141_v39, %v142_v47  ;;  %v123_v63 = vrot.slane %v122_v45, 1  ;;  %v150_v0 = vmax.f32 %v148_v42, %v149_v53 }
  0x29   :  { %v157_v1 = vmax.f32 %v155_v43, %v156_v54  ;;  %v170_v5 = vrot.slane %v169_v55, 2  ;;  %v130_v6 = vrot.slane %v129_v52, 1  ;;  %v164_v12 = vmax.f32 %v162_v49, %v163_v62 }
  0x2a   :  { %v137_v7 = vrot.slane %v136_v60, 1  ;;  %v144_v11 = vrot.slane %v143_v61, 1  ;;  %v82_v13 = vmax.f32 %v382_v51, %v81_v10  ;;  %v151_v17 = vrot.slane %v150_v0, 1 }
  0x2b   :  { %v158_v18 = vrot.slane %v157_v1, 1  ;;  %v171_v19 = vmax.f32 %v169_v55, %v170_v5  ;;  %v89_v21 = vmax.f32 %v384_v56, %v88_v14  ;;  %v96_v22 = vmax.f32 %v386_v57, %v95_v15 }
  0x2c   :  { %v103_v24 = vmax.f32 %v388_v58, %v102_v16  ;;  %v165_v26 = vrot.slane %v164_v12, 1  ;;  %v110_v27 = vmax.f32 %v390_v2, %v109_v25  ;;  %v117_v28 = vmax.f32 %v115_v20, %v116_v59  ;;  %v190_v58 = vld [vmem:[%s438_s0] sm:$0x3] }
  0x2d   :  { %v124_v29 = vmax.f32 %v122_v45, %v123_v63  ;;  %v172_v30 = vrot.slane %v171_v19, 1  ;;  %v75_v31 = vmax.f32 %v380_v50, %v74_v9  ;;  %v131_v51 = vmax.f32 %v129_v52, %v130_v6 }
  0x2e   :  { %v138_v10 = vmax.f32 %v136_v60, %v137_v7  ;;  %v145_v32 = vmax.f32 %v143_v61, %v144_v11  ;;  %v152_v33 = vmax.f32 %v150_v0, %v151_v17  ;;  %v159_v34 = vmax.f32 %v157_v1, %v158_v18 }
  0x2f   :  { %v166_v56 = vmax.f32 %v164_v12, %v165_v26  ;;  %v174_v57 = vmax.f32 %v394_v8, 0.0  ;;  %v173_v2 = vmax.f32 %v171_v19, %v172_v30  ;;  %v176_v14 = vmax.f32 %v82_v13, 0.0 }
  0x30   :  { %v177_v15 = vmax.f32 %v89_v21, 0.0  ;;  %v178_v16 = vmax.f32 %v96_v22, 0.0  ;;  %v179_v20 = vmax.f32 %v103_v24, 0.0  ;;  %v180_v50 = vmax.f32 %v110_v27, 0.0 }
  0x31   :  { %v181_v9 = vmax.f32 %v117_v28, 0.0  ;;  %v182_v25 = vmax.f32 %v124_v29, 0.0  ;;  %v183_v35 = vmax.f32 %v131_v51, 0.0  ;;  %v184_v36 = vmax.f32 %v138_v10, 0.0 }
  0x32   :  { %v195_v8 = vrot.slane %v190_v58, %v194_v3  ;;  %v199_v37 = vrot.slane %v190_v58, %v198_v4  ;;  %v175_v38 = vmax.f32 %v75_v31, 0.0  ;;  %v185_v39 = vmax.f32 %v145_v32, 0.0 }
  0x33   :  { %v186_v40 = vmax.f32 %v152_v33, 0.0  ;;  %v187_v41 = vmax.f32 %v159_v34, 0.0  ;;  %v188_v42 = vmax.f32 %v166_v56, 0.0  ;;  %v189_v43 = vmax.f32 %v173_v2, 0.0 }
  0x34   :  { %v202_v44 = vmul.f32 %v195_v8, %v174_v57  ;;  %v204_v45 = vmul.f32 %v195_v8, %v176_v14  ;;  %v205_v46 = vmul.f32 %v199_v37, %v177_v15  ;;  %v206_v47 = vmul.f32 %v195_v8, %v178_v16 }
  0x35   :  { %v207_v49 = vmul.f32 %v199_v37, %v179_v20  ;;  %v208_v52 = vmul.f32 %v195_v8, %v180_v50  ;;  %v209_v53 = vmul.f32 %v199_v37, %v181_v9  ;;  %v210_v3 = vmul.f32 %v195_v8, %v182_v25 }
  0x36   :  { %v211_v54 = vmul.f32 %v199_v37, %v183_v35  ;;  %v212_v55 = vmul.f32 %v195_v8, %v184_v36  ;;  %v203_v4 = vmul.f32 %v199_v37, %v175_v38  ;;  %v213_v59 = vmul.f32 %v199_v37, %v185_v39 }
  0x37   :  { %v214_v60 = vmul.f32 %v195_v8, %v186_v40  ;;  %v215_v61 = vmul.f32 %v199_v37, %v187_v41  ;;  %v216_v62 = vmul.f32 %v195_v8, %v188_v42  ;;  %v234_v63 = vrot.slane %v204_v45, 7 }
  0x38   :  { %v237_v0 = vrot.slane %v206_v47, 6  ;;  %v240_v1 = vrot.slane %v208_v52, 5  ;;  %v217_v5 = vmul.f32 %v199_v37, %v189_v43  ;;  %v243_v6 = vrot.slane %v210_v3, 4 }
  0x39   :  { %v246_v7 = vrot.slane %v212_v55, 3  ;;  %v255_v11 = vrot.slane %v205_v46, 7  ;;  %v236_v12 = vsel %vm235_vm0, %v234_v63, %v202_v44  ;;  %v257_v13 = vrot.slane %v207_v49, 6 }
  0x3a   :  { %v259_v17 = vrot.slane %v209_v53, 5  ;;  %v261_v18 = vrot.slane %v211_v54, 4  ;;  %v239_v19 = vsel %vm238_vm1, %v237_v0, %v236_v12  ;;  %v249_v21 = vrot.slane %v214_v60, 2 }
  0x3b   :  { %v256_v22 = vsel %vm235_vm0, %v255_v11, %v203_v4  ;;  %v263_v24 = vrot.slane %v213_v59, 3  ;;  %v242_v26 = vsel %vm241_vm2, %v240_v1, %v239_v19  ;;  %v252_v27 = vrot.slane %v216_v62, 1 }
  0x3c   :  { %v258_v28 = vsel %vm238_vm1, %v257_v13, %v256_v22  ;;  %v265_v29 = vrot.slane %v215_v61, 2  ;;  %v245_v30 = vsel %vm244_vm3, %v243_v6, %v242_v26  ;;  %v267_v51 = vrot.slane %v217_v5, 1 }
  0x3d   :  { %v260_v31 = vsel %vm241_vm2, %v259_v17, %v258_v28  ;;  %v248_v10 = vsel %vm247_vm4, %v246_v7, %v245_v30  ;;  %v279_v14 = vand.u32 127, %v192_v23  ;;  %v275_v15 = vstv %s439_s1 }
  0x3e   :  { %v262_v32 = vsel %vm244_vm3, %v261_v18, %v260_v31  ;;  %v251_v33 = vsel %vm250_vm5, %v249_v21, %v248_v10 }
  0x3f   :  { %v264_v34 = vsel %vm247_vm4, %v263_v24, %v262_v32  ;;  %v254_v56 = vsel %vm253_vm6, %v252_v27, %v251_v33  ;;  %v282_v16 = vsub.s32 %v279_v14, %v378_v48 }
  0x40   :  { %v266_v57 = vsel %vm250_vm5, %v265_v29, %v264_v34 }
  0x41   :  { %v268_v58 = vsel %vm253_vm6, %v267_v51, %v266_v57 }
  0x42   :  { %v271_v2 = vadd.f32 %v268_v58, %v254_v56 }
  0x44   :  { %272 = vadd.xlane.f32.xlu0 %v271_v2 }
  0xcd   :  { %v273_v20 = vpop.xlane.xlu0 %272 }
  0xce   :  { %v276_v50 = vadd.f32 %v275_v15, %v273_v20 }
  0xd0   :  { %v283_v9 = vrot.slane %v276_v50, %v282_v16 }
  0xd2   :  { %286 = vst.msk [vmem:[#allocation6] sm:$0x1] %vm285_vm7, %v283_v9 }
  0xd3   :  { %337 = shalt.err (!%p334_p9)
}
  0xd4   :  { %296 = dma.vmem_to_hbm [thread:$0]  %s294_s23, 16, %s441_s3, [#allocation5]  }
  0xd5   :  { %348 = dma.done.wait [#allocation5], 16  }
  0xd6   :  { %349 = vsyncadd [#allocation5], 4294967280 }
  0xd7   :  { %300 = vsyncpa [#allocation4], 1 }
  0xd8   :  { %301 = vsyncpa [#allocation5], 1 }

</bundles_post_ra>
